<compile_context>
chip_gen: v6e
topology: v6e:2x2x1
jax: 0.10.0
libtpu: 0.0.40
codegen_flags: <defaults>
</compile_context>

<pallas_src>
import jax
import jax.numpy as jnp
from jax import lax
from jax.experimental import pallas as pl
from jax.experimental.pallas import tpu as pltpu


LANE = 128      # TPU lane width (last-dim granularity)
TM_CAP = 512    # batch-tile cap
TN_CAP = 512    # out-features-tile cap
TK_CAP = 2048   # contraction-tile cap


def _round_up(a: int, m: int) -> int:
    return (a + m - 1) // m * m


def _sublane(dtype) -> int:
    """Native sublane granularity: 8 for 4-byte, 16 for 2-byte, 32 for 1-byte dtypes."""
    return max(8, 32 // jnp.dtype(dtype).itemsize)


def _is_v7x() -> bool:
    try:
        kind = jax.devices()[0].device_kind.lower()
    except Exception:
        return False
    return "7" in kind


def _choose_tile(size: int, unit: int, cap: int):
    """Pick (tile, padded) with tile % unit == 0, padded % tile == 0, padded >= size.

    Prefers minimal padding (only up to `unit` alignment) with the largest tile that
    divides the padded extent; if that tile would be pathologically small for a large
    dim, accept a little extra padding (<= ~12.5%) to get a full-size `cap` tile.
    """
    padded = _round_up(max(size, 1), unit)
    cap = max(unit, (min(cap, padded) // unit) * unit)
    tile = cap
    while padded % tile:
        tile -= unit
    if tile * 4 < cap:
        padded_alt = _round_up(size, cap)
        if padded_alt <= padded + max(unit, padded // 8):
            return cap, padded_alt
    return tile, padded


def _tile_config(B, K, N, x_dtype):
    tm, m_pad = _choose_tile(B, _sublane(x_dtype), TM_CAP)
    tn, n_pad = _choose_tile(N, LANE, TN_CAP)
    tk, k_pad = _choose_tile(K, LANE, TK_CAP)
    # v7x has 2 TensorCores per chip: make sure the "parallel" part of the grid has
    # >= 2 blocks when the batch axis collapses, so both cores get work.
    if _is_v7x() and m_pad // tm == 1 and n_pad // tn == 1 and n_pad >= 2 * LANE:
        tn = (n_pad // 2 // LANE) * LANE
        while n_pad % tn:
            tn -= LANE
    return tm, tn, tk, m_pad, n_pad, k_pad


# ---------------------------------------------------------------------------
# Kernels: one (i, j, k) grid step of y = x @ W.T + b
#   x_ref: (tm, tk)   rows of x, K-slice k
#   w_ref: (tn, tk)   rows of W (out-features tile j), K-slice k
#   b_ref: (1, tn)    bias tile j
#   o_ref: (tm, tn)   output tile (i, j), resident across the k axis
# ---------------------------------------------------------------------------

def _linear_kernel_f32out(x_ref, w_ref, b_ref, o_ref):
    """f32 output: accumulate directly into the resident output block (no scratch)."""
    k = pl.program_id(2)

    @pl.when(k == 0)
    def _():
        o_ref[...] = jnp.broadcast_to(b_ref[...].astype(jnp.float32), o_ref.shape)

    # Contract the in_features axis of both operands directly (no W.T materialization):
    # (tm, tk) x (tn, tk) -> (tm, tn), f32 accumulation on the MXU.
    o_ref[...] += lax.dot_general(
        x_ref[...],
        w_ref[...],
        dimension_numbers=(((1,), (1,)), ((), ())),
        preferred_element_type=jnp.float32,
    )


def _linear_kernel_acc(x_ref, w_ref, b_ref, o_ref, acc_ref):
    """Low-precision output: keep a separate f32 VMEM accumulator."""
    k = pl.program_id(2)

    @pl.when(k == 0)
    def _():
        acc_ref[...] = jnp.zeros_like(acc_ref)

    acc_ref[...] += lax.dot_general(
        x_ref[...],
        w_ref[...],
        dimension_numbers=(((1,), (1,)), ((), ())),
        preferred_element_type=jnp.float32,
    )

    @pl.when(k == pl.num_programs(2) - 1)
    def _():
        o_ref[...] = (
            acc_ref[...] + b_ref[...].astype(jnp.float32)
        ).astype(o_ref.dtype)


def _linear_padded(x_p, w_p, b_p, tm, tn, tk, out_dtype):
    """pallas_call on already lane-aligned, tile-divisible operands."""
    m_pad, k_pad = x_p.shape
    n_pad = w_p.shape[0]
    grid = (m_pad // tm, n_pad // tn, k_pad // tk)

    f32_out = jnp.dtype(out_dtype) == jnp.float32
    kernel = _linear_kernel_f32out if f32_out else _linear_kernel_acc
    scratch = [] if f32_out else [pltpu.VMEM((tm, tn), jnp.float32)]

    isz = jnp.dtype(x_p.dtype).itemsize
    osz = jnp.dtype(out_dtype).itemsize
    footprint = (
        2 * (tm * tk + tn * tk) * isz          # double-buffered x & W tiles
        + 2 * tm * tn * osz                    # double-buffered output tile
        + (0 if f32_out else tm * tn * 4)      # f32 accumulator scratch
        + 2 * tn * jnp.dtype(b_p.dtype).itemsize
    )
    # Tiles are capped so footprint never exceeds ~20 MiB; cap the scoped limit at
    # 48 MiB so it stays safe on v7x (64 MiB physical VMEM per TensorCore).
    vmem_limit = int(min(48 * 1024 * 1024, max(32 * 1024 * 1024, 2 * footprint)))

    return pl.pallas_call(
        kernel,
        out_shape=jax.ShapeDtypeStruct((m_pad, n_pad), out_dtype),
        grid_spec=pltpu.PrefetchScalarGridSpec(
            num_scalar_prefetch=0,
            grid=grid,
            in_specs=[
                pl.BlockSpec((tm, tk), lambda i, j, k: (i, k)),   # x
                pl.BlockSpec((tn, tk), lambda i, j, k: (j, k)),   # weight (out, in)
                pl.BlockSpec((1, tn), lambda i, j, k: (0, j)),    # bias
            ],
            out_specs=pl.BlockSpec((tm, tn), lambda i, j, k: (i, j)),
            scratch_shapes=scratch,
        ),
        compiler_params=pltpu.CompilerParams(
            dimension_semantics=("parallel", "parallel", "arbitrary"),
            vmem_limit_bytes=vmem_limit,
        ),
    )(x_p, w_p, b_p)


def linear_regression(x, weight, bias=None):
    """Functional forward: y = x @ weight.T + bias  (PyTorch nn.Linear layout)."""
    B, K = x.shape
    N, K2 = weight.shape
    assert K == K2, (x.shape, weight.shape)
    if bias is None:
        bias = jnp.zeros((N,), weight.dtype)
    assert bias.shape == (N,)

    tm, tn, tk, m_pad, n_pad, k_pad = _tile_config(B, K, N, x.dtype)

    # Pad only when needed (static shape checks: aligned shapes take the zero-copy path).
    x_p = x if (B, K) == (m_pad, k_pad) else (
        jnp.zeros((m_pad, k_pad), x.dtype).at[:B, :K].set(x))
    w_p = weight if (N, K) == (n_pad, k_pad) else (
        jnp.zeros((n_pad, k_pad), weight.dtype).at[:N, :K].set(weight))
    b_p = bias.reshape(1, N) if N == n_pad else (
        jnp.zeros((1, n_pad), bias.dtype).at[0, :N].set(bias))

    out_p = _linear_padded(x_p, w_p, b_p, tm, tn, tk, x.dtype)
    return out_p if (B, N) == (m_pad, n_pad) else out_p[:B, :N]


def init_params(key, input_dim, output_dim, dtype=jnp.float32):
    """Kaiming-uniform-like init matching nn.Linear defaults (a=sqrt(5))."""
    # TODO(synk): torch.manual_seed(111) exact values are not reproducible in JAX;
    # init follows the same distribution instead.
    k_w, k_b = jax.random.split(key)
    bound = 1.0 / (input_dim ** 0.5)
    weight = jax.random.uniform(k_w, (output_dim, input_dim), dtype, -bound, bound)
    bias = jax.random.uniform(k_b, (output_dim,), dtype, -bound, bound)
    return weight, bias


class LinearRegression:
    """JAX/Pallas port of the PyTorch LinearRegression module."""

    def __init__(self, input_dim, output_dim, bias=True, *, key=None,
                 dtype=jnp.float32):
        if key is None:
            key = jax.random.PRNGKey(111)
        self.input_dim = input_dim
        self.output_dim = output_dim
        w, b = init_params(key, input_dim, output_dim, dtype)
        self.weight = w
        self.bias = b if bias else None

        # Pre-pad / cache the lane-aligned weight and bias once: avoids an extra full
        # HBM read+write of W on every forward call (the dominant cost at small batch).
        # NOTE: for best MXU throughput on v6e/v7x, weights/activations could be fed as
        # bf16 with f32 accumulation — left as a model-level precision decision.
        _, n_pad = _choose_tile(output_dim, LANE, TN_CAP)
        _, k_pad = _choose_tile(input_dim, LANE, TK_CAP)
        self._n_pad, self._k_pad = n_pad, k_pad
        bvec = self.bias if self.bias is not None else jnp.zeros((output_dim,), dtype)
        self._w_p = w if (output_dim, input_dim) == (n_pad, k_pad) else (
            jnp.zeros((n_pad, k_pad), dtype).at[:output_dim, :input_dim].set(w))
        self._b_p = bvec.reshape(1, output_dim) if output_dim == n_pad else (
            jnp.zeros((1, n_pad), dtype).at[0, :output_dim].set(bvec))

    def __call__(self, x):
        B, K = x.shape
        assert K == self.input_dim, (x.shape, self.input_dim)
        tm, tn, tk, m_pad, n_pad, k_pad = _tile_config(
            B, K, self.output_dim, x.dtype)
        assert (n_pad, k_pad) == (self._n_pad, self._k_pad)
        x_p = x if (B, K) == (m_pad, k_pad) else (
            jnp.zeros((m_pad, k_pad), x.dtype).at[:B, :K].set(x))
        out_p = _linear_padded(x_p, self._w_p, self._b_p, tm, tn, tk, x.dtype)
        if (B, self.output_dim) == (m_pad, n_pad):
            return out_p
        return out_p[:B, :self.output_dim]

    def get_weights(self):
        if self.bias is not None:
            return {"weight": self.weight, "bias": self.bias}
        return {"weight": self.weight}


if __name__ == "__main__":
    key = jax.random.PRNGKey(0)
    k_x, k_p = jax.random.split(key)

    batch = 8
    input_dim = 32
    output_dim = 16

    x = jax.random.normal(k_x, (batch, input_dim), jnp.float32)

    # Module-style path (cached, pre-padded weights).
    model = LinearRegression(input_dim, output_dim, bias=True, key=k_p)
    y = jax.block_until_ready(model(x))

    # Plain-JAX reference.
    y_ref = x @ model.weight.T + model.bias
    assert y.shape == (batch, output_dim)
    assert jnp.allclose(y, y_ref, atol=1e-5, rtol=1e-5)
    assert not jnp.isnan(y).any()

    # Standalone functional path.
    y2 = jax.block_until_ready(linear_regression(x, model.weight, model.bias))
    assert jnp.allclose(y2, y_ref, atol=1e-5, rtol=1e-5)

    print("KERNEL_OK")
</pallas_src>

<mosaic_0001>
module attributes {stable_mosaic.version = 11 : i64} {
  func.func @_linear_kernel_f32out(%arg0: i32, %arg1: i32, %arg2: i32, %arg3: memref<8x128xf32, #tpu.memory_space<vmem>>, %arg4: memref<128x128xf32, #tpu.memory_space<vmem>>, %arg5: memref<1x128xf32, #tpu.memory_space<vmem>>, %arg6: memref<8x128xf32, #tpu.memory_space<vmem>>) attributes {dimension_semantics = [#tpu.dimension_semantics<parallel>, #tpu.dimension_semantics<parallel>, #tpu.dimension_semantics<arbitrary>], iteration_bounds = array<i64: 1, 1, 1>, scalar_prefetch = 0 : i64, scratch_operands = 0 : i64, tpu.core_type = #tpu.core_type<tc>, window_params = [{transform_indices = @transform_0, window_bounds = array<i64: 8, 128>}, {transform_indices = @transform_1, window_bounds = array<i64: 128, 128>}, {transform_indices = @transform_2, window_bounds = array<i64: 1, 128>}, {transform_indices = @transform_3, window_bounds = array<i64: 8, 128>}]} {
    %c0_i32 = arith.constant 0 : i32
    %0 = arith.cmpi eq, %arg2, %c0_i32 : i32
    %1 = arith.extui %0 : i1 to i32
    %c0_i32_0 = arith.constant 0 : i32
    %2 = arith.cmpi ne, %1, %c0_i32_0 : i32
    scf.if %2 {
      %c0_8 = arith.constant 0 : index
      %c0_9 = arith.constant 0 : index
      %9 = vector.load %arg5[%c0_8, %c0_9] : memref<1x128xf32, #tpu.memory_space<vmem>>, vector<1x128xf32>
      %10 = vector.shape_cast %9 : vector<1x128xf32> to vector<1x128xf32>
      %11 = vector.broadcast %10 : vector<1x128xf32> to vector<8x128xf32>
      %c0_10 = arith.constant 0 : index
      %c0_11 = arith.constant 0 : index
      %12 = vector.load %arg6[%c0_10, %c0_11] : memref<8x128xf32, #tpu.memory_space<vmem>>, vector<8x128xf32>
      tpu.vector_store %arg6[%c0_10, %c0_11], %11 {strides = array<i32>} : memref<8x128xf32, #tpu.memory_space<vmem>>, vector<8x128xf32>,
    } else {
    }
    %c0 = arith.constant 0 : index
    %c0_1 = arith.constant 0 : index
    %3 = vector.load %arg6[%c0, %c0_1] : memref<8x128xf32, #tpu.memory_space<vmem>>, vector<8x128xf32>
    %c0_2 = arith.constant 0 : index
    %c0_3 = arith.constant 0 : index
    %4 = vector.load %arg3[%c0_2, %c0_3] : memref<8x128xf32, #tpu.memory_space<vmem>>, vector<8x128xf32>
    %c0_4 = arith.constant 0 : index
    %c0_5 = arith.constant 0 : index
    %5 = vector.load %arg4[%c0_4, %c0_5] : memref<128x128xf32, #tpu.memory_space<vmem>>, vector<128x128xf32>
    %cst = arith.constant dense<0.000000e+00> : vector<8x128xf32>
    %6 = tpu.matmul %4, %5, %cst {dimension_numbers = #tpu.dot_dimension_numbers<[1], [1], [0], [0], [0, 0, 1, 0], [], []>} : vector<8x128xf32>, vector<128x128xf32>, vector<8x128xf32> -> vector<8x128xf32>
    %7 = arith.addf %3, %6 : vector<8x128xf32>
    %c0_6 = arith.constant 0 : index
    %c0_7 = arith.constant 0 : index
    %8 = vector.load %arg6[%c0_6, %c0_7] : memref<8x128xf32, #tpu.memory_space<vmem>>, vector<8x128xf32>
    tpu.vector_store %arg6[%c0_6, %c0_7], %7 {strides = array<i32>} : memref<8x128xf32, #tpu.memory_space<vmem>>, vector<8x128xf32>,
    return
  }
  func.func @transform_0(%arg0: i32, %arg1: i32, %arg2: i32) -> (i32, i32) {
    %c0_i32 = arith.constant 0 : i32
    return %arg0, %arg2 : i32, i32
  }
  func.func @transform_1(%arg0: i32, %arg1: i32, %arg2: i32) -> (i32, i32) {
    %c0_i32 = arith.constant 0 : i32
    return %arg1, %arg2 : i32, i32
  }
  func.func @transform_2(%arg0: i32, %arg1: i32, %arg2: i32) -> (i32, i32) {
    %c0_i32 = arith.constant 0 : i32
    %c0_i32_0 = arith.constant 0 : i32
    return %c0_i32, %arg1 : i32, i32
  }
  func.func @transform_3(%arg0: i32, %arg1: i32, %arg2: i32) -> (i32, i32) {
    %c0_i32 = arith.constant 0 : i32
    return %arg0, %arg1 : i32, i32
  }
}

</mosaic_0001>

<bundles_post_ra>
// kernel: tpu_custom_call.1
= control target key start
LH: loop header
LB: loop body
LE: loop exit
PB: predicated region body
PF: predicated region fallthrough
CT: control target
= control target key end

     0   :  { %8 = vsyncpa [#allocation3], 0  ;;  %s324_s0 = inlined_call_operand.hbm [shape: f32[8,128], index: 0, kind: input, shape index: {}]   ;;  %s325_s1 = inlined_call_operand.hbm [shape: f32[128,128], index: 1, kind: input, shape index: {}]   ;;  %s326_s2 = inlined_call_operand.vmem [shape: f32[1,128], index: 2, kind: input, shape index: {}]   ;;  %s327_s3 = inlined_call_operand.hbm [shape: f32[8,128], index: 3, kind: output, shape index: {}]  }
   0x1   :  { %9 = vsyncpa [#allocation6], 0 }
   0x2   :  { %10 = vsyncpa [#allocation4], 0  ;;  %s285_s12 = smov [#allocation2]   ;;  %s286_s14 = smov [#allocation5]  }
   0x3   :  { %s17_s13 = sshll.u32 %s285_s12, 4  ;;  %s26_s15 = sshll.u32 %s286_s14, 4  ;;  %s18_s13 = int_to_ptr.vmem [resolvable:$true] %s17_s13  ;;  %s27_s15 = int_to_ptr.vmem [resolvable:$true] %s26_s15 }
   0x4   :  { %s227_s16 = scalar_lea.vmem %s18_s13, 128  ;;  %p232_p1 = scmp.lt.s32.totalorder %s18_s13, %s18_s13 }
   0x5   :  { %p228_p0 = scmp.ne.s32.totalorder %s18_s13, %s227_s16  ;;  %p233_p2 = scmp.lt.s32.totalorder %s227_s16, %s227_s16 }
   0x7   :  { %p234_p3 = por %p233_p2, %p232_p1 }
   0x9   :  { %p235_p4 = pnand %p234_p3, %p228_p0 }
   0xb   :  { %238 = shalt.err (!%p235_p4)
}
   0xc   :  { %20 = dma.hbm_to_vmem [thread:$0]  %s324_s0, 128, %s18_s13, [#allocation3]  }
   0xd   :  { %s247_s19 = scalar_lea.vmem %s27_s15, 2048  ;;  %p252_p6 = scmp.lt.s32.totalorder %s27_s15, %s27_s15 }
   0xe   :  { %p248_p5 = scmp.ne.s32.totalorder %s27_s15, %s247_s19  ;;  %p253_p7 = scmp.lt.s32.totalorder %s247_s19, %s247_s19 }
  0x10   :  { %p254_p8 = por %p253_p7, %p252_p6 }
  0x12   :  { %p255_p9 = pnand %p254_p8, %p248_p5 }
  0x14   :  { %258 = shalt.err (!%p255_p9)
}
  0x15   :  { %s287_s20 = smov 128   ;;  %s288_s21 = smov 8  }
  0x16   :  { %32 = dma.hbm_to_vmem [thread:$0]  %s325_s1, 2048, %s27_s15, [#allocation6], %s287_s20, %s287_s20, %s288_s21  }
  0x17   :  { %279 = dma.done.wait [#allocation3], 128  }
  0x18   :  { %280 = vsyncadd [#allocation3], 4294967168 }
  0x19   :  { %281 = dma.done.wait [#allocation6], 2048  }
  0x1a   :  { %282 = vsyncadd [#allocation6], 4294965248  ;;  %v289_v0 = vmov 0.0   ;;  %vm290_vm0 = vmmov 0   ;;  %v70_v1 = vld [vmem:[#allocation5 + $0x78] sm:$0xff]  ;;  %v69_v2 = vld [vmem:[#allocation5 + $0x70] sm:$0xff] }
  0x1b   :  { %177 = vmatprep.subr.mxu0 %v289_v0  ;;  %209 = vmatprep.mubr.msk.f32.mxu0 %vm290_vm0, %v289_v0  ;;  %v68_v3 = vld [vmem:[#allocation5 + $0x68] sm:$0xff]  ;;  %v67_v4 = vld [vmem:[#allocation5 + $0x60] sm:$0xff]  ;;  %v66_v5 = vld [vmem:[#allocation5 + $0x58] sm:$0xff]  ;;  %s291_s24 = smov [#allocation7]  }
  0x1c   :  { %178 = vmatpush3.xpose.msra.mxu0 %v70_v1  ;;  %v65_v6 = vld [vmem:[#allocation5 + $0x50] sm:$0xff]  ;;  %v64_v7 = vld [vmem:[#allocation5 + $0x48] sm:$0xff]  ;;  %v63_v8 = vld [vmem:[#allocation5 + $0x40] sm:$0xff]  ;;  %s149_s25 = sshll.u32 %s291_s24, 4  ;;  %s150_s25 = int_to_ptr.vmem [resolvable:$true] %s149_s25 }
  0x1d   :  { %179 = vmatprep.subr.mxu0 %v289_v0  ;;  %v62_v9 = vld [vmem:[#allocation5 + $0x38] sm:$0xff]  ;;  %v61_v10 = vld [vmem:[#allocation5 + $0x30] sm:$0xff]  ;;  %v60_v11 = vld [vmem:[#allocation5 + $0x28] sm:$0xff]  ;;  %s259_s26 = scalar_lea.vmem %s150_s25, 128  ;;  %p264_p11 = scmp.lt.s32.totalorder %s150_s25, %s150_s25 }
  0x1e   :  { %v59_v12 = vld [vmem:[#allocation5 + $0x20] sm:$0xff]  ;;  %v58_v13 = vld [vmem:[#allocation5 + $0x18] sm:$0xff]  ;;  %v57_v14 = vld [vmem:[#allocation5 + $0x10] sm:$0xff]  ;;  %p260_p10 = scmp.ne.s32.totalorder %s150_s25, %s259_s26  ;;  %p265_p12 = scmp.lt.s32.totalorder %s259_s26, %s259_s26 }
  0x1f   :  { %v56_v15 = vld [vmem:[#allocation5 + $0x8] sm:$0xff]  ;;  %v55_v16 = vld [vmem:[#allocation5] sm:$0xff]  ;;  %v54_v17 = vld [vmem:[#allocation2] sm:$0xff] }
  0x20   :  { %180 = vmatpush3.xpose.msra.mxu0 %v69_v2  ;;  %v159_v18 = vld [vmem:[%s326_s2] ss:$0 sm:$0xff]  ;;  %p266_p13 = por %p265_p12, %p264_p11 }
  0x21   :  { %181 = vmatprep.subr.mxu0 %v289_v0 }
  0x22   :  { %p267_p0 = pnand %p266_p13, %p260_p10 }
  0x24   :  { %182 = vmatpush3.xpose.msra.mxu0 %v68_v3 }
  0x25   :  { %183 = vmatprep.subr.mxu0 %v289_v0 }
  0x28   :  { %184 = vmatpush3.xpose.msra.mxu0 %v67_v4 }
  0x29   :  { %185 = vmatprep.subr.mxu0 %v289_v0 }
  0x2c   :  { %186 = vmatpush3.xpose.msra.mxu0 %v66_v5 }
  0x2d   :  { %187 = vmatprep.subr.mxu0 %v289_v0 }
  0x30   :  { %188 = vmatpush3.xpose.msra.mxu0 %v65_v6 }
  0x31   :  { %189 = vmatprep.subr.mxu0 %v289_v0 }
  0x34   :  { %190 = vmatpush3.xpose.msra.mxu0 %v64_v7 }
  0x35   :  { %191 = vmatprep.subr.mxu0 %v289_v0 }
  0x38   :  { %192 = vmatpush3.xpose.msra.mxu0 %v63_v8 }
  0x39   :  { %193 = vmatprep.subr.mxu0 %v289_v0 }
  0x3c   :  { %194 = vmatpush3.xpose.msra.mxu0 %v62_v9 }
  0x3d   :  { %195 = vmatprep.subr.mxu0 %v289_v0 }
  0x40   :  { %196 = vmatpush3.xpose.msra.mxu0 %v61_v10 }
  0x41   :  { %197 = vmatprep.subr.mxu0 %v289_v0 }
  0x44   :  { %198 = vmatpush3.xpose.msra.mxu0 %v60_v11 }
  0x45   :  { %199 = vmatprep.subr.mxu0 %v289_v0 }
  0x48   :  { %200 = vmatpush3.xpose.msra.mxu0 %v59_v12 }
  0x49   :  { %201 = vmatprep.subr.mxu0 %v289_v0 }
  0x4c   :  { %202 = vmatpush3.xpose.msra.mxu0 %v58_v13 }
  0x4d   :  { %203 = vmatprep.subr.mxu0 %v289_v0 }
  0x50   :  { %204 = vmatpush3.xpose.msra.mxu0 %v57_v14 }
  0x51   :  { %205 = vmatprep.subr.mxu0 %v289_v0 }
  0x54   :  { %206 = vmatpush3.xpose.msra.mxu0 %v56_v15 }
  0x55   :  { %207 = vmatprep.subr.mxu0 %v289_v0 }
  0x58   :  { %208 = vmatpush3.xpose.msra.mxu0 %v55_v16 }
  0x5b   :  { %210 = vmatmul.mubr.f32.vlgmr.msra.gmra.mxu0 %v54_v17 }
 0x11b   :  { %v137_v19 = vpop.f32.mrf.mxu0 }
 0x11c   :  { %v141_v20 = vadd.f32 %v159_v18, %v137_v19 }
 0x11d   :  { %v211_v21 = vpop.f32.mrf.mxu0 }
 0x11e   :  { %142 = vst [vmem:[#allocation7] sm:$0xff] %v141_v20 }
 0x11f   :  { %270 = shalt.err (!%p267_p0)
}
 0x120   :  { %152 = dma.vmem_to_hbm [thread:$0]  %s150_s25, 128, %s327_s3, [#allocation4]  }
 0x121   :  { %283 = dma.done.wait [#allocation4], 128  }
 0x122   :  { %284 = vsyncadd [#allocation4], 4294967168 }
 0x123   :  { %156 = vsyncpa [#allocation3], 1 }
 0x124   :  { %157 = vsyncpa [#allocation6], 1 }
 0x125   :  { %158 = vsyncpa [#allocation4], 1 }

</bundles_post_ra>
